<compile_context>
chip_gen: v6e
topology: v6e:2x2x1
jax: 0.10.0
libtpu: 0.0.40
codegen_flags: <defaults>
</compile_context>

<pallas_src>
import functools

import jax
import jax.numpy as jnp
from jax.experimental import pallas as pl
from jax.experimental.pallas import tpu as pltpu


# ---------------------------------------------------------------------------
# Fused kernel: one batch tile holds the full (C, H*W) slab in VMEM.
# ---------------------------------------------------------------------------
def _se_fused_kernel(x_ref, w1t_ref, w2t_ref, o_ref, *, inv_hw):
    # x_ref: (TB, C, HW); w1t_ref: (C, Cr); w2t_ref: (Cr, C)
    # Squeeze: global average pool (sum / true HW), accumulate in f32.
    y = jnp.sum(x_ref[...].astype(jnp.float32), axis=-1) * jnp.float32(inv_hw)
    # Excitation: Linear -> ReLU -> Linear -> Sigmoid (tiny MXU work,
    # fully hidden under the HBM DMA stream).
    h = jnp.maximum(jnp.dot(y, w1t_ref[...], preferred_element_type=jnp.float32), 0.0)
    s = jax.nn.sigmoid(jnp.dot(h, w2t_ref[...], preferred_element_type=jnp.float32))
    # Scale: re-stream x from VMEM rather than keeping one huge SSA value.
    o_ref[...] = (x_ref[...].astype(jnp.float32) * s[:, :, None]).astype(o_ref.dtype)


# ---------------------------------------------------------------------------
# Spatially tiled fallback (per-batch slab too large for VMEM).
# Pass 1: accumulate per-channel sums over spatial tiles, emit sigmoid gate.
# ---------------------------------------------------------------------------
def _se_gate_kernel(x_ref, w1t_ref, w2t_ref, s_ref, acc_ref, *, hw, thw):
    sp = pl.program_id(1)

    @pl.when(sp == 0)
    def _():
        acc_ref[...] = jnp.zeros_like(acc_ref)

    # Mask the (possibly out-of-bounds) spatial tail of the last tile so the
    # undefined padding never pollutes the sum.
    pos = sp * thw + jax.lax.broadcasted_iota(jnp.int32, x_ref.shape, 2)
    xb = jnp.where(pos < hw, x_ref[...].astype(jnp.float32), 0.0)
    acc_ref[...] += jnp.sum(xb, axis=-1)

    @pl.when(sp == pl.num_programs(1) - 1)
    def _():
        y = acc_ref[...] * jnp.float32(1.0 / hw)
        h = jnp.maximum(jnp.dot(y, w1t_ref[...], preferred_element_type=jnp.float32), 0.0)
        s = jax.nn.sigmoid(jnp.dot(h, w2t_ref[...], preferred_element_type=jnp.float32))
        s_ref[...] = s[:, None, :]


# Pass 2: apply the precomputed gate while streaming x a second time.
def _se_scale_kernel(x_ref, s_ref, o_ref):
    s = s_ref[...][:, 0, :]                                   # (TB, C)
    o_ref[...] = (x_ref[...].astype(jnp.float32) * s[:, :, None]).astype(o_ref.dtype)


# ---------------------------------------------------------------------------
# Wrapper-side tiling policy.
# ---------------------------------------------------------------------------
def _hw_budgets():
    """Generation-aware VMEM limit / block budget / target pipeline depth."""
    vmem_cap = 128 << 20
    try:
        info = pltpu.get_tpu_info()
        vmem_cap = int(getattr(info, "vmem_capacity_bytes", vmem_cap))
    except Exception:
        pass
    if vmem_cap <= (64 << 20):
        # v7x-like: 64 MiB per TensorCore, 2 TCs -> want an even, deep grid.
        return {"vmem_limit": 48 << 20, "block_budget": 14 << 20, "min_grid": 8}
    # v5e / v6e: 128 MiB VMEM -> bigger blocks amortize per-step overhead.
    return {"vmem_limit": 64 << 20, "block_budget": 28 << 20, "min_grid": 4}


def _choose_batch_tile(B, bytes_per_batch_block, budget_bytes, min_grid):
    """Largest divisor of B whose double-buffered in+out blocks fit the budget,
    while keeping grid extent >= min_grid (pipeline depth / megacore balance)."""
    max_tb = max(1, budget_bytes // max(1, bytes_per_batch_block))
    if B >= min_grid:
        max_tb = min(max_tb, max(1, B // min_grid))
    else:
        max_tb = 1        # small B: maximize pipeline depth instead
    return max(d for d in range(1, B + 1) if B % d == 0 and d <= max_tb)


def se_layer(x_nchw, w1, w2, *, force_spatial_tiling=False, max_block_bytes=None):
    """SELayer forward.  x_nchw: (B, C, H, W); w1: (Cr, C); w2: (C, Cr)."""
    B, C, H, W = x_nchw.shape
    HW = H * W
    dtype = x_nchw.dtype
    itemsize = jnp.dtype(dtype).itemsize

    x3 = x_nchw.reshape(B, C, HW)          # free, contiguous reshape
    w1t = w1.T                             # (C, Cr)
    w2t = w2.T                             # (Cr, C)

    cfg = _hw_budgets()
    vmem_limit = cfg["vmem_limit"]
    budget = max_block_bytes if max_block_bytes is not None else cfg["block_budget"]
    min_grid = cfg["min_grid"]

    # in + out, double-buffered, for one batch element's full spatial slab.
    per_b_full = 4 * C * HW * itemsize
    use_fused = (per_b_full <= budget) and not force_spatial_tiling
    if HW < 128:
        use_fused = True                   # spatial axis too small to tile

    if use_fused:
        TB = _choose_batch_tile(B, per_b_full, budget, min_grid)
        out = pl.pallas_call(
            functools.partial(_se_fused_kernel, inv_hw=1.0 / HW),
            out_shape=jax.ShapeDtypeStruct((B, C, HW), dtype),
            grid_spec=pltpu.PrefetchScalarGridSpec(
                num_scalar_prefetch=0,
                grid=(B // TB,),
                in_specs=[
                    pl.BlockSpec((TB, C, HW), lambda b: (b, 0, 0)),
                    pl.BlockSpec(w1t.shape, lambda b: (0, 0)),
                    pl.BlockSpec(w2t.shape, lambda b: (0, 0)),
                ],
                out_specs=pl.BlockSpec((TB, C, HW), lambda b: (b, 0, 0)),
            ),
            compiler_params=pltpu.CompilerParams(
                dimension_semantics=("parallel",),
                vmem_limit_bytes=vmem_limit,
            ),
        )(x3, w1t, w2t)
        return out.reshape(B, C, H, W)

    # ---- Spatially tiled fallback ------------------------------------------
    TB = 1
    thw_cap = max(1, budget // (4 * C * itemsize))
    thw = max(128, (thw_cap // 128) * 128)
    thw = min(thw, pl.cdiv(HW, 128) * 128)
    n_sp = pl.cdiv(HW, thw)

    # Pass 1: gate.  Spatial reduction axis last, "arbitrary".
    gate = pl.pallas_call(
        functools.partial(_se_gate_kernel, hw=HW, thw=thw),
        out_shape=jax.ShapeDtypeStruct((B, 1, C), jnp.float32),
        grid_spec=pltpu.PrefetchScalarGridSpec(
            num_scalar_prefetch=0,
            grid=(B // TB, n_sp),
            in_specs=[
                pl.BlockSpec((TB, C, thw), lambda b, sp: (b, 0, sp)),
                pl.BlockSpec(w1t.shape, lambda b, sp: (0, 0)),
                pl.BlockSpec(w2t.shape, lambda b, sp: (0, 0)),
            ],
            out_specs=pl.BlockSpec((TB, 1, C), lambda b, sp: (b, 0, 0)),
            scratch_shapes=[pltpu.VMEM((TB, C), jnp.float32)],
        ),
        compiler_params=pltpu.CompilerParams(
            dimension_semantics=("parallel", "arbitrary"),
            vmem_limit_bytes=vmem_limit,
        ),
    )(x3, w1t, w2t)

    # Pass 2: apply the gate (out-of-bounds tail writes are dropped by Pallas).
    out = pl.pallas_call(
        _se_scale_kernel,
        out_shape=jax.ShapeDtypeStruct((B, C, HW), dtype),
        grid_spec=pltpu.PrefetchScalarGridSpec(
            num_scalar_prefetch=0,
            grid=(B // TB, n_sp),
            in_specs=[
                pl.BlockSpec((TB, C, thw), lambda b, sp: (b, 0, sp)),
                pl.BlockSpec((TB, 1, C), lambda b, sp: (b, 0, 0)),
            ],
            out_specs=pl.BlockSpec((TB, C, thw), lambda b, sp: (b, 0, sp)),
        ),
        compiler_params=pltpu.CompilerParams(
            dimension_semantics=("parallel", "parallel"),
            vmem_limit_bytes=vmem_limit,
        ),
    )(x3, gate)
    return out.reshape(B, C, H, W)


def se_layer_ref(x_nchw, w1, w2):
    """Pure-JAX reference matching the PyTorch module."""
    y = jnp.mean(x_nchw, axis=(2, 3))                  # (B, C)
    h = jnp.maximum(y @ w1.T, 0.0)                     # (B, Cr)
    s = jax.nn.sigmoid(h @ w2.T)                       # (B, C)
    return x_nchw * s[:, :, None, None]


if __name__ == "__main__":
    key = jax.random.PRNGKey(0)
    reduction = 16

    # --- Fused path (small spatial slab fits VMEM) ---------------------------
    B, C, H, W = 4, 64, 8, 8
    Cr = int(C / reduction)                                  # 4
    kx, k1, k2, kx2, k3, k4 = jax.random.split(key, 6)
    x = jax.random.normal(kx, (B, C, H, W), dtype=jnp.float32)
    w1 = jax.random.uniform(k1, (Cr, C), jnp.float32, -1.0, 1.0) / jnp.sqrt(C)
    w2 = jax.random.uniform(k2, (C, Cr), jnp.float32, -1.0, 1.0) / jnp.sqrt(Cr)

    out = jax.block_until_ready(se_layer(x, w1, w2))
    ref = se_layer_ref(x, w1, w2)
    assert out.shape == (B, C, H, W)
    assert jnp.allclose(out, ref, atol=1e-5, rtol=1e-5), "fused path mismatch"

    # --- Spatially tiled fallback path (forced; exercises masked tail) ------
    B2, C2, H2, W2 = 2, 32, 20, 20
    Cr2 = int(C2 / reduction)                                # 2
    x2 = jax.random.normal(kx2, (B2, C2, H2, W2), dtype=jnp.float32)
    w1b = jax.random.uniform(k3, (Cr2, C2), jnp.float32, -1.0, 1.0) / jnp.sqrt(C2)
    w2b = jax.random.uniform(k4, (C2, Cr2), jnp.float32, -1.0, 1.0) / jnp.sqrt(Cr2)

    out2 = jax.block_until_ready(
        se_layer(x2, w1b, w2b, force_spatial_tiling=True, max_block_bytes=64 << 10))
    ref2 = se_layer_ref(x2, w1b, w2b)
    assert out2.shape == (B2, C2, H2, W2)
    assert jnp.allclose(out2, ref2, atol=1e-5, rtol=1e-5), "tiled path mismatch"

    print("KERNEL_OK")
</pallas_src>

<mosaic_0001>
module attributes {stable_mosaic.version = 11 : i64} {
  func.func @_se_fused_kernel(%arg0: i32, %arg1: memref<1x64x64xf32, #tpu.memory_space<vmem>>, %arg2: memref<64x4xf32, #tpu.memory_space<vmem>>, %arg3: memref<4x64xf32, #tpu.memory_space<vmem>>, %arg4: memref<1x64x64xf32, #tpu.memory_space<vmem>>) attributes {dimension_semantics = [#tpu.dimension_semantics<parallel>], iteration_bounds = array<i64: 4>, scalar_prefetch = 0 : i64, scratch_operands = 0 : i64, tpu.core_type = #tpu.core_type<tc>, window_params = [{transform_indices = @transform_0, window_bounds = array<i64: 1, 64, 64>}, {pipeline_mode = #tpu.pipeline_mode<synchronous>, transform_indices = @transform_1, window_bounds = array<i64: 64, 4>}, {pipeline_mode = #tpu.pipeline_mode<synchronous>, transform_indices = @transform_2, window_bounds = array<i64: 4, 64>}, {transform_indices = @transform_3, window_bounds = array<i64: 1, 64, 64>}]} {
    %c0 = arith.constant 0 : index
    %c0_0 = arith.constant 0 : index
    %c0_1 = arith.constant 0 : index
    %0 = vector.load %arg1[%c0, %c0_0, %c0_1] : memref<1x64x64xf32, #tpu.memory_space<vmem>>, vector<1x64x64xf32>
    %cst = arith.constant dense<0.000000e+00> : vector<1x64xf32>
    %1 = vector.multi_reduction <add>, %0, %cst [2] : vector<1x64x64xf32> to vector<1x64xf32>
    %cst_2 = arith.constant 1.562500e-02 : f32
    %2 = vector.broadcast %cst_2 : f32 to vector<1x64xf32>
    %3 = arith.mulf %1, %2 : vector<1x64xf32>
    %c0_3 = arith.constant 0 : index
    %c0_4 = arith.constant 0 : index
    %4 = vector.load %arg2[%c0_3, %c0_4] : memref<64x4xf32, #tpu.memory_space<vmem>>, vector<64x4xf32>
    %cst_5 = arith.constant dense<0.000000e+00> : vector<1x4xf32>
    %5 = tpu.matmul %3, %4, %cst_5 {dimension_numbers = #tpu.dot_dimension_numbers<[1], [0], [0], [1], [0, 0, 1, 1], [], []>} : vector<1x64xf32>, vector<64x4xf32>, vector<1x4xf32> -> vector<1x4xf32>
    %cst_6 = arith.constant 0.000000e+00 : f32
    %6 = vector.broadcast %cst_6 : f32 to vector<1x4xf32>
    %7 = arith.maximumf %5, %6 : vector<1x4xf32>
    %c0_7 = arith.constant 0 : index
    %c0_8 = arith.constant 0 : index
    %8 = vector.load %arg3[%c0_7, %c0_8] : memref<4x64xf32, #tpu.memory_space<vmem>>, vector<4x64xf32>
    %cst_9 = arith.constant dense<0.000000e+00> : vector<1x64xf32>
    %9 = tpu.matmul %7, %8, %cst_9 {dimension_numbers = #tpu.dot_dimension_numbers<[1], [0], [0], [1], [0, 0, 1, 1], [], []>} : vector<1x4xf32>, vector<4x64xf32>, vector<1x64xf32> -> vector<1x64xf32>
    %10 = arith.negf %9 : vector<1x64xf32>
    %11 = math.exp %10 : vector<1x64xf32>
    %cst_10 = arith.constant 1.000000e+00 : f32
    %12 = vector.broadcast %cst_10 : f32 to vector<1x64xf32>
    %13 = arith.addf %12, %11 : vector<1x64xf32>
    %14 = arith.divf %12, %13 : vector<1x64xf32>
    %c0_11 = arith.constant 0 : index
    %c0_12 = arith.constant 0 : index
    %c0_13 = arith.constant 0 : index
    %15 = vector.load %arg1[%c0_11, %c0_12, %c0_13] : memref<1x64x64xf32, #tpu.memory_space<vmem>>, vector<1x64x64xf32>
    %16 = vector.shape_cast %14 : vector<1x64xf32> to vector<1x64x1xf32>
    %17 = vector.broadcast %16 : vector<1x64x1xf32> to vector<1x64x64xf32>
    %18 = arith.mulf %15, %17 : vector<1x64x64xf32>
    %c0_14 = arith.constant 0 : index
    %c0_15 = arith.constant 0 : index
    %c0_16 = arith.constant 0 : index
    %19 = vector.load %arg4[%c0_14, %c0_15, %c0_16] : memref<1x64x64xf32, #tpu.memory_space<vmem>>, vector<1x64x64xf32>
    tpu.vector_store %arg4[%c0_14, %c0_15, %c0_16], %18 {strides = array<i32>} : memref<1x64x64xf32, #tpu.memory_space<vmem>>, vector<1x64x64xf32>,
    return
  }
  func.func @transform_0(%arg0: i32) -> (i32, i32, i32) {
    %c0_i32 = arith.constant 0 : i32
    %c0_i32_0 = arith.constant 0 : i32
    %c0_i32_1 = arith.constant 0 : i32
    return %arg0, %c0_i32, %c0_i32_0 : i32, i32, i32
  }
  func.func @transform_1(%arg0: i32) -> (i32, i32) {
    %c0_i32 = arith.constant 0 : i32
    %c0_i32_0 = arith.constant 0 : i32
    %c0_i32_1 = arith.constant 0 : i32
    return %c0_i32, %c0_i32_0 : i32, i32
  }
  func.func @transform_2(%arg0: i32) -> (i32, i32) {
    %c0_i32 = arith.constant 0 : i32
    %c0_i32_0 = arith.constant 0 : i32
    %c0_i32_1 = arith.constant 0 : i32
    return %c0_i32, %c0_i32_0 : i32, i32
  }
  func.func @transform_3(%arg0: i32) -> (i32, i32, i32) {
    %c0_i32 = arith.constant 0 : i32
    %c0_i32_0 = arith.constant 0 : i32
    %c0_i32_1 = arith.constant 0 : i32
    return %arg0, %c0_i32, %c0_i32_0 : i32, i32, i32
  }
}

</mosaic_0001>

<bundles_post_ra>
// kernel: tpu_custom_call.1
= control target key start
LH: loop header
LB: loop body
LE: loop exit
PB: predicated region body
PF: predicated region fallthrough
CT: control target
= control target key end

     0   :  { %8 = vsyncpa [#allocation3], 0  ;;  %s1073_s0 = inlined_call_operand.hbm [shape: f32[4,64,64], index: 0, kind: input, shape index: {}]   ;;  %s1074_s1 = inlined_call_operand.vmem [shape: f32[64,4], index: 1, kind: input, shape index: {}]   ;;  %s1075_s2 = inlined_call_operand.vmem [shape: f32[4,64], index: 2, kind: input, shape index: {}]   ;;  %s1076_s3 = inlined_call_operand.hbm [shape: f32[4,64,64], index: 3, kind: output, shape index: {}]  }
   0x1   :  { %10 = vsyncpa [#allocation3 + $0x1], 0 }
   0x2   :  { %11 = vsyncpa [#allocation4], 0 }
   0x3   :  { %13 = vsyncpa [#allocation4 + $0x1], 0  ;;  %s830_s12 = smov 0   ;;  %s832_s13 = smov 0  }
   0x4   :  { %s834_s14 = smov 0   ;;  %s836_s15 = smov 0  }
   0x5 LB: > { %s851_s16 = sadd.s32 4294967295, %s800_s15   ;;  %s597_s17 = sadd.s32 4294967294, %s800_s15   ;;  %s800_s15 = sphi %s836_s15, %s1090_s15   ;;  %s796_s14 = sphi %s834_s14, %s1089_s14   ;;  %s792_s13 = sphi %s832_s13, %s1088_s13   ;;  %s788_s12 = sphi %s830_s12, %s1087_s12  }
   0x6   : > { %s855_s18 = sadd.s32 1, %s800_s15   ;;  %s26_s19 = sadd.s32 1, %s796_s14 }
   0x7   : > { %s23_s20 = ssub.s32 %s800_s15, %s855_s18  ;;  %p33_p0 = scmp.ne.s32.totalorder %s796_s14, %s792_s13 }
   0x8   : > { %p24_p1 = scmp.eq.s32.totalorder %s23_s20, 0  ;;  %p34_p2 = scmp.eq.s32.totalorder %s800_s15, 0 }
   0x9   : > { %p39_p3 = scmp.ne.s32.totalorder %s792_s13, %s788_s12  ;;  %p40_p4 = scmp.eq.s32.totalorder %s851_s16, 0 }
   0xa   : > { %s867_s21 = scalar_select %p24_p1, %s796_s14, %s26_s19  }
   0xb   : > { %p869_p5 = por %p34_p2, %p33_p0  ;;  %p873_p6 = por %p40_p4, %p39_p3 }
   0xc   : > { %p105_p7 = scmp.eq.s32.totalorder %s851_s16, 3  ;;  %p111_p8 = scmp.eq.s32.totalorder %s597_s17, 3 }
   0xd   : > { %s1080_s23 = scalar_select %p873_p6, 1, 0 }
   0xe   : > { %p664_p9 = scmp.lt.s32.totalorder %s800_s15, 4  ;;  %p879_p10 = por %p105_p7, %p33_p0 }
   0xf   : > { %p883_p11 = por %p111_p8, %p39_p3  ;;  %s137_s26 = sand.u32 1, %s796_s14  }
  0x10   : > { %s1081_s24 = scalar_select %p879_p10, 1, 0 }
  0x11   : > { %s1082_s25 = scalar_select %p883_p11, 1, 0 }
  0x12   : > { %s615_s27 = sshll.u32 %s800_s15, 10  ;;  %s600_s28 = sshll.u32 %s137_s26, 6 }
  0x13   : > { %s892_s4 = scalar_lea.hbm %s1073_s0, %s615_s27  ;;  %s141_s5 = scalar_lea.vmem [#allocation2], %s600_s28 }
  0x14   : > { %s148_s6 = sshll.u32 %s141_s5, 4  ;;  %p896_p12 = pnand %p664_p9, %p869_p5  ;;  %s900_s6 = int_to_ptr.vmem [resolvable:$true] %s148_s6 }
  0x15   : > { %s902_s8 = scalar_lea.sflag [#allocation3], %s137_s26  ;;  %s708_s9 = scalar_lea.hbm %s892_s4, 1024 }
  0x16   : > { %p709_p13 = scmp.ne.s32.totalorder %s892_s4, %s708_s9  ;;  %p710_p0 = pneg %p896_p12 }
  0x17   : > { %s713_s17 = scalar_lea.hbm %s1073_s0, 4096  ;;  %p714_p3 = scmp.lt.s32.totalorder %s892_s4, %s1073_s0 }
  0x18   : > { %p711_p1 = pnand %p710_p0, %p709_p13  ;;  %p715_p4 = scmp.lt.s32.totalorder %s713_s17, %s708_s9 }
  0x1a   : > { %p712_p2 = pneg %p711_p1  ;;  %p716_p5 = por %p715_p4, %p714_p3 }
  0x1c   : > { %p717_p7 = pnand %p716_p5, %p712_p2 }
  0x1e   : > { %720 = shalt.err (!%p717_p7)
}
  0x1f   : > { %s721_s22 = scalar_lea.vmem %s900_s6, 1024  ;;  %s802_s26 = smov [#allocation2]  }
  0x20   : > { %p722_p8 = scmp.ne.s32.totalorder %s900_s6, %s721_s22  ;;  %s726_s27 = sshll.u32 %s802_s26, 4  ;;  %s727_s27 = int_to_ptr.vmem [resolvable:$false] %s726_s27 }
  0x21   : > { %s728_s28 = scalar_lea.vmem %s727_s27, 2048  ;;  %p729_p1 = scmp.lt.s32.totalorder %s900_s6, %s727_s27 }
  0x22   : > { %p724_p9 = pnand %p722_p8, %p710_p0  ;;  %p730_p11 = scmp.lt.s32.totalorder %s728_s28, %s721_s22 }
  0x24   : > { %p725_p13 = pneg %p724_p9  ;;  %p731_p10 = por %p730_p11, %p729_p1 }
  0x26   : > { %p732_p6 = pnand %p731_p10, %p725_p13 }
  0x28   : > { %735 = shalt.err (!%p732_p6)
}
  0x29   : > { %s803_s29 = smov 128   ;;  %s804_s30 = smov 8  }
  0x2a   : > { %659 = dma.hbm_to_vmem [thread:$0]  (!%p896_p12), %s892_s4, 1024, %s900_s6, %s902_s8, %s803_s29, %s803_s29, %s804_s30  }
  0x2b   : > { %p603_p0 = scmp.ge.s32.totalorder %s800_s15, 1  ;;  %p156_p2 = scmp.lt.s32.totalorder %s800_s15, 5 }
  0x2d   : > { %p157_p3 = pnand %p603_p0, %p156_p2 }
  0x2e   : > { %s926_s5 = sand.u32 (!%p157_p3), 1, %s792_s13   ;;  %p1084_p6 = scmp.ne.s32.totalorder (!%p157_p3), %s1080_s23, 0 }
  0x2f   : > { %160 = sbr.rel (%p157_p3) target bundleno = 780 (0x30c), region = 32  ;;  %s604_s9 = sshll.u32 (!%p157_p3), %s926_s5, 6 }
  0x30   : > { %s163_s10 = scalar_lea.sflag (!%p157_p3), [#allocation3], %s926_s5  ;;  %s166_s11 = scalar_lea.vmem (!%p157_p3), [#allocation2], %s604_s9 }
  0x34   : > { %779 = dma.done.wait (%p1084_p6), %s163_s10, 1024  }
  0x35   : > { %781 = vsyncadd (%p1084_p6), %s163_s10, 4294966272  ;;  %vm197_vm0 = vcmask 523264   ;;  %v936_v0 = vld [vmem:[%s166_s11] sm:$0xff]  ;;  %v938_v1 = vld [vmem:[%s166_s11 + $0x10] sm:$0xff]  ;;  %v805_v17 = vmov 0.0   ;;  %vm806_vm1 = vmmov 0   ;;  %v246_v25 = vlaneseq }
  0x36   : > { %v940_v2 = vld [vmem:[%s166_s11 + $0x8] sm:$0xff]  ;;  %v198_v3 = vsel %vm197_vm0, %v936_v0, 0.0  ;;  %v204_v4 = vsel %vm197_vm0, %v938_v1, 0.0  ;;  %v946_v5 = vld [vmem:[%s166_s11 + $0x18] sm:$0xff]  ;;  %v952_v8 = vld [vmem:[%s166_s11 + $0x20] sm:$0xff]  ;;  %628 = vmatprep.subr.mxu0 %v805_v17  ;;  %647 = vmatprep.subr.mxu1 %v805_v17  ;;  %vm257_vm2 = vcmask 130112  }
  0x37   : > { %199 = vadd.xlane.f32.xlu0 %v198_v3  ;;  %205 = vadd.xlane.f32.xlu1 %v204_v4  ;;  %v201_v6 = vsel %vm197_vm0, %v940_v2, 0.0  ;;  %v207_v7 = vsel %vm197_vm0, %v946_v5, 0.0  ;;  %v954_v9 = vld [vmem:[%s166_s11 + $0x28] sm:$0xff]  ;;  %v210_v10 = vsel %vm197_vm0, %v952_v8, 0.0  ;;  %v960_v12 = vld [vmem:[%s166_s11 + $0x30] sm:$0xff]  ;;  %v962_v13 = vld [vmem:[%s166_s11 + $0x38] sm:$0xff] }
  0x38   : > { %v213_v11 = vsel %vm197_vm0, %v954_v9, 0.0  ;;  %v216_v14 = vsel %vm197_vm0, %v960_v12, 0.0  ;;  %v219_v15 = vsel %vm197_vm0, %v962_v13, 0.0  ;;  %v237_v16 = vld [vmem:[%s1074_s1 + $0x38] sm:$0xff]  ;;  %v236_v18 = vld [vmem:[%s1074_s1 + $0x30] sm:$0xff]  ;;  %v235_v19 = vld [vmem:[%s1074_s1 + $0x28] sm:$0xff]  ;;  %644 = vmatprep.mubr.msk.f32.mxu0 %vm806_vm1, %v805_v17  ;;  %649 = vmatprep.mubr.msk.f32.mxu1 %vm806_vm1, %v805_v17 }
  0x39   : > { %629 = vmatpush3.msra.mxu0 %v237_v16  ;;  %v234_v20 = vld [vmem:[%s1074_s1 + $0x20] sm:$0xff]  ;;  %v233_v21 = vld [vmem:[%s1074_s1 + $0x18] sm:$0xff]  ;;  %v232_v22 = vld [vmem:[%s1074_s1 + $0x10] sm:$0xff]  ;;  %v247_v26 = vand.u32 127, %v246_v25  ;;  %v992_v27 = vshrl.u32 %v246_v25, 7  ;;  %vm264_vm3 = vcmask 195712  }
  0x3a   : > { %630 = vmatprep.subr.mxu0 %v805_v17  ;;  %v231_v23 = vld [vmem:[%s1074_s1 + $0x8] sm:$0xff]  ;;  %v230_v24 = vld [vmem:[%s1074_s1] sm:$0xff]  ;;  %vm271_vm4 = vcmask 261312   ;;  %vm278_vm5 = vcmask 326912   ;;  %vm285_vm6 = vcmask 392512   ;;  %vm292_vm7 = vcmask 458112  }
  0x3b   : > { %202 = vadd.xlane.f32.xlu0 %v201_v6  ;;  %208 = vadd.xlane.f32.xlu1 %v207_v7  ;;  %v252_v28 = vadd.s32 4294967288, %v247_v26  ;;  %v266_v29 = vadd.s32 4294967272, %v247_v26  ;;  %v259_v31 = vadd.s32 4294967280, %v247_v26  ;;  %v273_v33 = vadd.s32 4294967264, %v247_v26  ;;  %s188_s6 = scalar_lea.vmem [#allocation5], %s604_s9  ;;  %s616_s9 = sshll.u32 %s851_s16, 10 }
  0x3c   : > { %631 = vmatpush3.msra.mxu0 %v236_v18  ;;  %v250_v34 = vsub.s32 %v247_v26, %v992_v27  ;;  %v280_v42 = vadd.s32 4294967256, %v247_v26  ;;  %v287_v46 = vadd.s32 4294967248, %v247_v26  ;;  %v294_v50 = vadd.s32 4294967240, %v247_v26  ;;  %v374_v18 = vld [vmem:[%s1075_s2] sm:$0xf]  ;;  %s524_s7 = sshll.u32 %s188_s6, 4  ;;  %s1027_s19 = scalar_lea.hbm %s1076_s3, %s616_s9  ;;  %s1029_s7 = int_to_ptr.vmem [resolvable:$true] %s524_s7 }
  0x3d   : > { %632 = vmatprep.subr.mxu0 %v805_v17  ;;  %v255_v36 = vsub.s32 %v252_v28, %v992_v27  ;;  %v269_v37 = vsub.s32 %v266_v29, %v992_v27  ;;  %v262_v38 = vsub.s32 %v259_v31, %v992_v27  ;;  %v276_v45 = vsub.s32 %v273_v33, %v992_v27  ;;  %s511_s20 = scalar_lea.sflag [#allocation4], %s926_s5  ;;  %s736_s16 = scalar_lea.vmem %s1029_s7, 1024 }
  0x3e   : > { %633 = vmatpush3.msra.mxu0 %v235_v19  ;;  %v283_v53 = vsub.s32 %v280_v42, %v992_v27  ;;  %v290_v61 = vsub.s32 %v287_v46, %v992_v27  ;;  %v297_v62 = vsub.s32 %v294_v50, %v992_v27  ;;  %vm299_vm8 = vcmask 523712   ;;  %p737_p10 = scmp.ne.s32.totalorder %s1029_s7, %s736_s16  ;;  %p1085_p11 = scmp.ne.s32.totalorder %s1081_s24, 0 }
  0x3f   : > { %211 = vadd.xlane.f32.xlu0 %v210_v10  ;;  %214 = vadd.xlane.f32.xlu1 %v213_v11  ;;  %vm379_vm9 = vcmask 1043456   ;;  %vm375_vm10 = vcmask 31744   ;;  %v461_v28 = vsub.s32 0, %v992_v27  ;;  %s807_s22 = smov [#allocation5]  }
  0x40   : > { %634 = vmatprep.subr.mxu0 %v805_v17  ;;  %648 = vmatpush3.msk.msra.mxu1 %vm379_vm9, %v374_v18  ;;  %p738_p12 = pnand %p737_p10, %p1085_p11  ;;  %s740_s26 = sshll.u32 %s807_s22, 4  ;;  %s741_s26 = int_to_ptr.vmem [resolvable:$false] %s740_s26 }
  0x41   : > { %635 = vmatpush3.msra.mxu0 %v234_v20  ;;  %s742_s27 = scalar_lea.vmem %s741_s26, 2048  ;;  %p743_p5 = scmp.lt.s32.totalorder %s1029_s7, %s741_s26 }
  0x42   : > { %636 = vmatprep.subr.mxu0 %v805_v17  ;;  %p739_p4 = pneg %p738_p12  ;;  %p744_p7 = scmp.lt.s32.totalorder %s742_s27, %s736_s16 }
  0x43   : > { %217 = vadd.xlane.f32.xlu0 %v216_v14  ;;  %220 = vadd.xlane.f32.xlu1 %v219_v15 }
  0x44   : > { %637 = vmatpush3.msra.mxu0 %v233_v21  ;;  %p745_p8 = por %p744_p7, %p743_p5 }
  0x45   : > { %638 = vmatprep.subr.mxu0 %v805_v17 }
  0x46   : > { %639 = vmatpush3.msra.mxu0 %v232_v22  ;;  %p746_p9 = pnand %p745_p8, %p739_p4 }
  0x47   : > { %640 = vmatprep.subr.mxu0 %v805_v17 }
  0x48   : > { %641 = vmatpush3.msra.mxu0 %v231_v23 }
  0x49   : > { %642 = vmatprep.subr.mxu0 %v805_v17 }
  0x4a   : > { %643 = vmatpush3.msra.mxu0 %v230_v24 }
  0xc0   : > { %v200_v30 = vpop.xlane.xlu0 %199  ;;  %v206_v32 = vpop.xlane.xlu1 %205 }
  0xc1   : > { %v222_v35 = vmul.f32 0.015625, %v200_v30  ;;  %v224_v39 = vmul.f32 0.015625, %v206_v32 }
  0xc3   : > { %v251_v47 = vrot.slane %v222_v35, %v250_v34  ;;  %v263_v51 = vrot.slane %v224_v39, %v262_v38 }
  0xc4   : > { %v203_v40 = vpop.xlane.xlu0 %202  ;;  %v209_v41 = vpop.xlane.xlu1 %208 }
  0xc5   : > { %v223_v43 = vmul.f32 0.015625, %v203_v40  ;;  %v225_v44 = vmul.f32 0.015625, %v209_v41 }
  0xc7   : > { %v256_v48 = vrot.slane %v223_v43, %v255_v36  ;;  %v270_v49 = vrot.slane %v225_v44, %v269_v37 }
  0xc8   : > { %v212_v52 = vpop.xlane.xlu0 %211  ;;  %v215_v54 = vpop.xlane.xlu1 %214 }
  0xc9   : > { %v258_v55 = vsel %vm257_vm2, %v256_v48, %v251_v47  ;;  %v226_v56 = vmul.f32 0.015625, %v212_v52  ;;  %v227_v57 = vmul.f32 0.015625, %v215_v54 }
  0xca   : > { %v265_v58 = vsel %vm264_vm3, %v263_v51, %v258_v55 }
  0xcb   : > { %v272_v59 = vsel %vm271_vm4, %v270_v49, %v265_v58  ;;  %v277_v60 = vrot.slane %v226_v56, %v276_v45  ;;  %v284_v63 = vrot.slane %v227_v57, %v283_v53 }
  0xcc   : > { %v218_v3 = vpop.xlane.xlu0 %217  ;;  %v221_v4 = vpop.xlane.xlu1 %220 }
  0xcd   : > { %v279_v6 = vsel %vm278_vm5, %v277_v60, %v272_v59  ;;  %v228_v7 = vmul.f32 0.015625, %v218_v3  ;;  %v229_v10 = vmul.f32 0.015625, %v221_v4 }
  0xce   : > { %v286_v15 = vsel %vm285_vm6, %v284_v63, %v279_v6 }
  0xcf   : > { %v291_v11 = vrot.slane %v228_v7, %v290_v61  ;;  %v298_v14 = vrot.slane %v229_v10, %v297_v62 }
  0xd1   : > { %v293_v16 = vsel %vm292_vm7, %v291_v11, %v286_v15 }
  0xd2   : > { %v300_v17 = vsel %vm299_vm8, %v298_v14, %v293_v16 }
  0xd3   : > { %645 = vmatmul.mubr.msk.f32.vlgmr.msra.gmra.mxu0 %vm197_vm0, %v300_v17 }
 0x193   : > { %v369_v19 = vpop.f32.mrf.mxu0 }
 0x194   : > { %v373_v20 = vmax.f32 %v369_v19, 0.0 }
 0x195   : > { %v646_v21 = vpop.f32.mrf.mxu0 }
 0x196   : > { %650 = vmatmul.mubr.msk.f32.vlgmr.msra.gmra.mxu1 %vm375_vm10, %v373_v20 }
 0x256   : > { %v449_v22 = vpop.f32.mrf.mxu1 }
 0x257   : > { %v609_v23 = vmul.f32 -1.442695, %v449_v22 }
 0x258   : > { %v651_v24 = vpop.f32.mrf.mxu1 }
 0x259   : > { %704 = vpow2.f32 %v609_v23 }
 0x266   : > { %v705_v25 = vpop.eup %704 }
 0x267   : > { %v456_v26 = vadd.f32 1.0, %v705_v25 }
 0x269   : > { %706 = vrcp.f32 %v456_v26 }
 0x276   : > { %v707_v29 = vpop.eup %706 }
 0x277   : > { %v462_v30 = vrot.slane %v707_v29, %v461_v28 }
 0x279   : > { %468 = vbcast.lane.b32.xlu1 %v462_v30, 264  ;;  %464 = vbcast.lane.b32.xlu0 %v462_v30, 256 }
 0x27d   : > { %472 = vbcast.lane.b32.xlu1 %v462_v30, 272  ;;  %480 = vbcast.lane.b32.xlu0 %v462_v30, 288 }
 0x281   : > { %476 = vbcast.lane.b32.xlu1 %v462_v30, 280  ;;  %488 = vbcast.lane.b32.xlu0 %v462_v30, 304 }
 0x285   : > { %484 = vbcast.lane.b32.xlu1 %v462_v30, 296 }
 0x289   : > { %492 = vbcast.lane.b32.xlu1 %v462_v30, 312 }
 0x2eb   : > { %v469_v31 = vpop.permute.xlu1 %468  ;;  %v465_v32 = vpop.permute.xlu0 %464 }
 0x2ec   : > { %v495_v33 = vmul.f32 %v469_v31, %v940_v2  ;;  %v494_v34 = vmul.f32 %v465_v32, %v936_v0 }
 0x2ee   : > { %503 = vst.msk [vmem:[%s188_s6 + $0x8] sm:$0xff] %vm197_vm0, %v495_v33  ;;  %502 = vst.msk [vmem:[%s188_s6] sm:$0xff] %vm197_vm0, %v494_v34 }
 0x2ef   : > { %v473_v27 = vpop.permute.xlu1 %472  ;;  %v481_v35 = vpop.permute.xlu0 %480 }
 0x2f0   : > { %v496_v36 = vmul.f32 %v473_v27, %v938_v1  ;;  %v498_v37 = vmul.f32 %v481_v35, %v952_v8 }
 0x2f2   : > { %504 = vst.msk [vmem:[%s188_s6 + $0x10] sm:$0xff] %vm197_vm0, %v496_v36  ;;  %506 = vst.msk [vmem:[%s188_s6 + $0x20] sm:$0xff] %vm197_vm0, %v498_v37 }
 0x2f3   : > { %v477_v2 = vpop.permute.xlu1 %476  ;;  %v489_v0 = vpop.permute.xlu0 %488 }
 0x2f4   : > { %v497_v38 = vmul.f32 %v477_v2, %v946_v5  ;;  %v500_v39 = vmul.f32 %v489_v0, %v960_v12 }
 0x2f6   : > { %505 = vst.msk [vmem:[%s188_s6 + $0x18] sm:$0xff] %vm197_vm0, %v497_v38  ;;  %508 = vst.msk [vmem:[%s188_s6 + $0x30] sm:$0xff] %vm197_vm0, %v500_v39 }
 0x2f7   : > { %v485_v40 = vpop.permute.xlu1 %484 }
 0x2f8   : > { %v499_v1 = vmul.f32 %v485_v40, %v954_v9 }
 0x2fa   : > { %507 = vst.msk [vmem:[%s188_s6 + $0x28] sm:$0xff] %vm197_vm0, %v499_v1 }
 0x2fb   : > { %v493_v8 = vpop.permute.xlu1 %492 }
 0x2fc   : > { %v501_v5 = vmul.f32 %v493_v8, %v962_v13 }
 0x2fe   : > { %509 = vst.msk [vmem:[%s188_s6 + $0x38] sm:$0xff] %vm197_vm0, %v501_v5 }
 0x2ff   : > { %749 = shalt.err (!%p746_p9)
}
 0x300   : > { %s750_s28 = scalar_lea.hbm %s1027_s19, 1024  ;;  %s754_s10 = scalar_lea.hbm %s1076_s3, 4096 }
 0x301   : > { %p751_p13 = scmp.ne.s32.totalorder %s1027_s19, %s750_s28  ;;  %p755_p2 = scmp.lt.s32.totalorder %s1027_s19, %s1076_s3 }
 0x302   : > { %p756_p3 = scmp.lt.s32.totalorder %s754_s10, %s750_s28 }
 0x303   : > { %p752_p1 = pnand %p751_p13, %p1085_p11 }
 0x304   : > { %p757_p6 = por %p756_p3, %p755_p2 }
 0x305   : > { %p753_p0 = pneg %p752_p1 }
 0x307   : > { %p758_p10 = pnand %p757_p6, %p753_p0 }
 0x309   : > { %761 = shalt.err (!%p758_p10)
}
 0x30a   : > { %s808_s4 = smov 128   ;;  %s809_s6 = smov 8  }
 0x30b   : > { %654 = dma.vmem_to_hbm [thread:$0]  (%p1085_p11), %s1029_s7, 1024, %s1027_s19, %s511_s20, %s808_s4, %s808_s4, %s809_s6  }
 0x30c PF: > { %p665_p12 = scmp.ge.s32.totalorder %s800_s15, 2  ;;  %s539_s9 = sand.u32 1, %s788_s12  }
 0x30d   : > { %p1086_p4 = scmp.ne.s32.totalorder %s1082_s25, 0  ;;  %s540_s8 = scalar_lea.sflag [#allocation4], %s539_s9 }
 0x30f   : > { %p661_p5 = pnand %p665_p12, %p1086_p4 }
 0x311   : > { %p662_p7 = pneg %p661_p5 }
 0x313   : > { %783 = dma.done.wait (%p662_p7), %s540_s8, 1024  }
 0x314   : > { %785 = vsyncadd (%p662_p7), %s540_s8, 4294966272  ;;  %p16_p8 = scmp.ge.s32.totalorder %s855_s18, 6   ;;  %s1087_s12 = smov %s792_s13 }
 0x315   : > { %s1088_s13 = smov %s796_s14  ;;  %s1089_s14 = smov %s867_s21 }
 0x316   : > { %s1090_s15 = smov %s855_s18  ;;  %18 = sbr.rel (!%p16_p8) target bundleno = 5 (0x5), region = 77 }
 0x31b   :  { %545 = vsyncpa [#allocation3], 1 }
 0x31c   :  { %547 = vsyncpa [#allocation3 + $0x1], 1 }
 0x31d   :  { %548 = vsyncpa [#allocation4], 1 }
 0x31e   :  { %550 = vsyncpa [#allocation4 + $0x1], 1 }

</bundles_post_ra>
